<compile_context>
chip_gen: v7x
topology: tpu7x:2x2x1
jax: 0.10.0
libtpu: 0.0.40
codegen_flags: <defaults>
</compile_context>

<pallas_src>
import functools

import jax
import jax.numpy as jnp
from jax import lax
from jax.experimental import pallas as pl
from jax.experimental.pallas import tpu as pltpu


# ---------------------------------------------------------------------------
# Hardware-aware sizing helpers
# ---------------------------------------------------------------------------

def _round_up(x, m):
    return ((x + m - 1) // m) * m


def _tpu_vmem_capacity_bytes():
    try:
        info = pltpu.get_tpu_info()
        cap = getattr(info, "vmem_capacity_bytes", None)
        if cap:
            return int(cap)
    except Exception:
        pass
    return 64 << 20  # conservative fallback == v7x per-TensorCore VMEM


def _num_tensorcores():
    try:
        info = pltpu.get_tpu_info()
        for attr in ("num_cores", "core_count", "num_tensorcores", "num_tensor_cores"):
            v = getattr(info, attr, None)
            if v:
                return int(v)
    except Exception:
        pass
    try:
        v = getattr(jax.devices()[0], "num_cores", None)
        if v:
            return int(v)
    except Exception:
        pass
    return 1


def _default_vmem_budget_bytes():
    """Tile-sizing budget == compiler VMEM limit, per chip generation."""
    cap = _tpu_vmem_capacity_bytes()
    if cap <= (64 << 20):
        # v7x: 64 MiB per TensorCore -> keep headroom for scratch/temporaries.
        return min(cap * 3 // 4, 44 << 20)
    # v5e / v6e: 128 MiB physical -> use ~70% of it.
    return min(cap * 7 // 10, 96 << 20)


def _choose_channel_tile(N, C, in_itemsize, out_itemsize, budget, prefer_min_steps):
    """Lane-dense channel tile for the single-block (full batch) path.

    C must already be a multiple of 128.  Returns None when even a 128-lane
    full-batch block does not fit the budget (-> two-pass path).
    The per-lane cost includes double-buffered x and y blocks plus f32
    upcast/working copies (matters for bf16 inputs).
    """
    n_padded = max(_round_up(N, 8), 8)
    bytes_per_lane = n_padded * (2 * in_itemsize + 2 * out_itemsize + 12)
    max_tc = (budget // bytes_per_lane) // 128 * 128
    if max_tc < 128:
        return None
    candidates = [t for t in range(128, C + 1, 128) if C % t == 0]
    for want_steps in range(max(prefer_min_steps, 1), 0, -1):
        fitting = [t for t in candidates
                   if t <= max_tc and C // t >= want_steps
                   and (want_steps == 1 or t >= min(512, C))]
        if fitting:
            return max(fitting)
    return None


def _choose_two_pass_tiles(N, C, in_itemsize, out_itemsize, budget):
    """(tc, tn) for the large-N two-pass path; None if N can't be chunked."""
    tn_candidates = [t for t in range(8, N + 1, 8) if N % t == 0]
    if not tn_candidates:
        return None
    tc_candidates = [t for t in range(128, C + 1, 128) if C % t == 0]
    bytes_per_elem = 2 * in_itemsize + 2 * out_itemsize + 12
    for tc in sorted(tc_candidates, reverse=True):
        for tn in sorted(tn_candidates, reverse=True):
            if tn * tc * bytes_per_elem <= budget:
                return tc, tn
    return None


# ---------------------------------------------------------------------------
# Kernels
# ---------------------------------------------------------------------------

def _modulation_kernel(x_ref, gamma_ref, beta_ref, rm_ref, rv_ref,
                       y_ref, new_rm_ref, new_rv_ref, *, eps, momentum):
    """Full-batch block per channel tile: stats + normalize + EMA fused."""
    x = x_ref[...].astype(jnp.float32)               # (N, tc)
    n = x.shape[0]
    inv_n = 1.0 / n

    mean = jnp.sum(x, axis=0, keepdims=True) * inv_n
    diff = x - mean                                  # only feeds the reduction
    var = jnp.sum(diff * diff, axis=0, keepdims=True) * inv_n

    inv_std = lax.rsqrt(var + eps)
    gamma = gamma_ref[...].astype(jnp.float32)
    beta = beta_ref[...].astype(jnp.float32)
    # Fold mean into a per-channel shift: the output path is a single FMA on x.
    scale = gamma * inv_std
    shift = beta - mean * scale
    y_ref[...] = (x * scale + shift).astype(y_ref.dtype)

    # Fused running-stats EMA (biased variance, matching the module).
    one_m = 1.0 - momentum
    new_rm_ref[...] = (momentum * mean +
                       one_m * rm_ref[...].astype(jnp.float32)).astype(new_rm_ref.dtype)
    new_rv_ref[...] = (momentum * var +
                       one_m * rv_ref[...].astype(jnp.float32)).astype(new_rv_ref.dtype)


def _stats_kernel(x_ref, gamma_ref, beta_ref, rm_ref, rv_ref,
                  scale_ref, shift_ref, new_rm_ref, new_rv_ref,
                  sum_ref, sumsq_ref, *, eps, momentum, n_total):
    """Two-pass path, pass 1: per-channel sum/sumsq over batch chunks."""
    i = pl.program_id(1)  # batch-chunk (reduction) axis, innermost

    @pl.when(i == 0)
    def _():
        sum_ref[...] = jnp.zeros_like(sum_ref)
        sumsq_ref[...] = jnp.zeros_like(sumsq_ref)

    x = x_ref[...].astype(jnp.float32)               # (tn, tc)
    sum_ref[...] += jnp.sum(x, axis=0, keepdims=True)
    sumsq_ref[...] += jnp.sum(x * x, axis=0, keepdims=True)

    @pl.when(i == pl.num_programs(1) - 1)
    def _():
        inv_n = 1.0 / n_total                        # FULL batch size, not chunk
        mean = sum_ref[...] * inv_n
        # Single-pass variance in f32; clamp at 0 against rounding.  For inputs
        # with |mean| >> std this can lose precision vs. the two-pass form.
        var = jnp.maximum(sumsq_ref[...] * inv_n - mean * mean, 0.0)
        inv_std = lax.rsqrt(var + eps)
        gamma = gamma_ref[...].astype(jnp.float32)
        beta = beta_ref[...].astype(jnp.float32)
        scale = gamma * inv_std
        scale_ref[...] = scale
        shift_ref[...] = beta - mean * scale
        one_m = 1.0 - momentum
        new_rm_ref[...] = (momentum * mean +
                           one_m * rm_ref[...].astype(jnp.float32)).astype(new_rm_ref.dtype)
        new_rv_ref[...] = (momentum * var +
                           one_m * rv_ref[...].astype(jnp.float32)).astype(new_rv_ref.dtype)


def _apply_kernel(x_ref, scale_ref, shift_ref, y_ref):
    """Two-pass path, pass 2: y = x * scale + shift (pure streaming FMA)."""
    x = x_ref[...].astype(jnp.float32)
    y_ref[...] = (x * scale_ref[...] + shift_ref[...]).astype(y_ref.dtype)


# ---------------------------------------------------------------------------
# Wrapper
# ---------------------------------------------------------------------------

def modulation_forward(x, gamma, beta, running_mean, running_var,
                       *, eps=1e-5, momentum=0.1,
                       channel_tile=None, vmem_budget_bytes=None,
                       force_two_pass=False, two_pass_tiles=None):
    """Training-mode forward. Returns (y, new_running_mean, new_running_var)."""
    N, C = x.shape
    if vmem_budget_bytes is None:
        vmem_budget_bytes = _default_vmem_budget_bytes()
    vmem_budget_bytes = int(vmem_budget_bytes)
    cores = _num_tensorcores()
    prefer_min_steps = 1 if cores <= 1 else 2 * cores

    # Pad channels to a multiple of 128: lane-dense unmasked stores and
    # multi-step pipelining / megacore sharding even for awkward C.
    C_pad = max(_round_up(C, 128), 128)
    if C_pad != C:
        pad = C_pad - C
        x_p = jnp.pad(x, ((0, 0), (0, pad)))
        gamma_p = jnp.pad(gamma, (0, pad))
        beta_p = jnp.pad(beta, (0, pad))
        rm_p = jnp.pad(running_mean, (0, pad))
        rv_p = jnp.pad(running_var, (0, pad))
    else:
        x_p, gamma_p, beta_p, rm_p, rv_p = x, gamma, beta, running_mean, running_var

    gamma2d = gamma_p.reshape(1, C_pad)
    beta2d = beta_p.reshape(1, C_pad)
    rm2d = rm_p.reshape(1, C_pad)
    rv2d = rv_p.reshape(1, C_pad)

    in_isz = x.dtype.itemsize
    out_isz = x.dtype.itemsize

    tc = None
    use_two_pass = bool(force_two_pass)
    if not use_two_pass:
        if channel_tile is not None:
            tc = min(channel_tile, C_pad)
            assert C_pad % tc == 0 and tc % 128 == 0, "channel_tile must be lane-dense and divide padded C"
        else:
            tc = _choose_channel_tile(N, C_pad, in_isz, out_isz,
                                      vmem_budget_bytes, prefer_min_steps)
            if tc is None:
                use_two_pass = True  # full-batch block no longer fits (large N)

    tiles = None
    if use_two_pass:
        tiles = two_pass_tiles
        if tiles is None:
            tiles = _choose_two_pass_tiles(N, C_pad, in_isz, out_isz,
                                           vmem_budget_bytes)
        if tiles is None:
            # TODO(synk): pad/mask the batch axis when N has no multiple-of-8
            # divisor; fall back to a single full-batch block (may spill).
            use_two_pass = False
            tc = 128
        else:
            assert tiles[0] % 128 == 0 and C_pad % tiles[0] == 0
            assert tiles[1] % 8 == 0 and N % tiles[1] == 0

    if not use_two_pass:
        kernel = functools.partial(_modulation_kernel, eps=eps, momentum=momentum)
        row_spec = pl.BlockSpec((1, tc), lambda j: (0, j))
        y, new_rm, new_rv = pl.pallas_call(
            kernel,
            out_shape=(
                jax.ShapeDtypeStruct((N, C_pad), x.dtype),
                jax.ShapeDtypeStruct((1, C_pad), running_mean.dtype),
                jax.ShapeDtypeStruct((1, C_pad), running_var.dtype),
            ),
            grid_spec=pltpu.PrefetchScalarGridSpec(
                num_scalar_prefetch=0,
                grid=(C_pad // tc,),
                in_specs=[
                    pl.BlockSpec((N, tc), lambda j: (0, j)),   # x
                    row_spec, row_spec, row_spec, row_spec,    # gamma, beta, rm, rv
                ],
                out_specs=[
                    pl.BlockSpec((N, tc), lambda j: (0, j)),   # y
                    row_spec, row_spec,                        # new rm, new rv
                ],
            ),
            compiler_params=pltpu.CompilerParams(
                dimension_semantics=("parallel",),
                vmem_limit_bytes=vmem_budget_bytes),
        )(x_p, gamma2d, beta2d, rm2d, rv2d)
    else:
        tc, tn = tiles
        stats_kernel = functools.partial(_stats_kernel, eps=eps,
                                         momentum=momentum, n_total=N)
        row_spec2 = pl.BlockSpec((1, tc), lambda j, i: (0, j))
        scale, shift, new_rm, new_rv = pl.pallas_call(
            stats_kernel,
            out_shape=(
                jax.ShapeDtypeStruct((1, C_pad), jnp.float32),       # scale
                jax.ShapeDtypeStruct((1, C_pad), jnp.float32),       # shift
                jax.ShapeDtypeStruct((1, C_pad), running_mean.dtype),
                jax.ShapeDtypeStruct((1, C_pad), running_var.dtype),
            ),
            grid_spec=pltpu.PrefetchScalarGridSpec(
                num_scalar_prefetch=0,
                grid=(C_pad // tc, N // tn),   # channel parallel, batch-chunk last
                in_specs=[
                    pl.BlockSpec((tn, tc), lambda j, i: (i, j)),     # x
                    row_spec2, row_spec2, row_spec2, row_spec2,
                ],
                out_specs=[row_spec2, row_spec2, row_spec2, row_spec2],
                scratch_shapes=[pltpu.VMEM((1, tc), jnp.float32),    # sum
                                pltpu.VMEM((1, tc), jnp.float32)],   # sumsq
            ),
            compiler_params=pltpu.CompilerParams(
                dimension_semantics=("parallel", "arbitrary"),
                vmem_limit_bytes=vmem_budget_bytes),
        )(x_p, gamma2d, beta2d, rm2d, rv2d)

        y = pl.pallas_call(
            _apply_kernel,
            out_shape=jax.ShapeDtypeStruct((N, C_pad), x.dtype),
            grid_spec=pltpu.PrefetchScalarGridSpec(
                num_scalar_prefetch=0,
                grid=(C_pad // tc, N // tn),
                in_specs=[
                    pl.BlockSpec((tn, tc), lambda j, i: (i, j)),     # x
                    row_spec2, row_spec2,                            # scale, shift
                ],
                out_specs=pl.BlockSpec((tn, tc), lambda j, i: (i, j)),
            ),
            compiler_params=pltpu.CompilerParams(
                dimension_semantics=("parallel", "parallel"),
                vmem_limit_bytes=vmem_budget_bytes),
        )(x_p, scale, shift)

    new_rm = new_rm.reshape(C_pad)[:C]
    new_rv = new_rv.reshape(C_pad)[:C]
    if C_pad != C:
        y = y[:, :C]
    return y, new_rm, new_rv


# ---------------------------------------------------------------------------
# Reference & self-test
# ---------------------------------------------------------------------------

def _reference(x, gamma, beta, running_mean, running_var, eps, momentum):
    mean = x.mean(axis=0)
    var = x.var(axis=0)  # biased (ddof=0) == unbiased=False
    x_hat = (x - mean) / jnp.sqrt(var + eps)
    y = gamma * x_hat + beta
    new_rm = momentum * mean + (1.0 - momentum) * running_mean
    new_rv = momentum * var + (1.0 - momentum) * running_var
    return y, new_rm, new_rv


if __name__ == "__main__":
    key = jax.random.PRNGKey(0)
    eps, momentum = 1e-5, 0.1

    def run_case(N, C, kseed, **kw):
        k1, k2, k3 = jax.random.split(jax.random.fold_in(key, kseed), 3)
        x = jax.random.normal(k1, (N, C), dtype=jnp.float32)
        gamma = jnp.ones((C,), jnp.float32) + 0.1 * jax.random.normal(k2, (C,))
        beta = 0.1 * jax.random.normal(k3, (C,))
        rm = jnp.zeros((C,), jnp.float32)
        rv = jnp.ones((C,), jnp.float32)
        y, nrm, nrv = modulation_forward(x, gamma, beta, rm, rv,
                                         eps=eps, momentum=momentum, **kw)
        jax.block_until_ready((y, nrm, nrv))
        y_r, rm_r, rv_r = _reference(x, gamma, beta, rm, rv, eps, momentum)
        assert y.shape == y_r.shape
        assert jnp.allclose(y, y_r, atol=1e-4, rtol=1e-4), f"y mismatch ({N},{C})"
        assert jnp.allclose(nrm, rm_r, atol=1e-5, rtol=1e-5), f"running_mean mismatch ({N},{C})"
        assert jnp.allclose(nrv, rv_r, atol=1e-5, rtol=1e-5), f"running_var mismatch ({N},{C})"

    run_case(8, 256, 0)                                  # single-block lane-dense path
    run_case(8, 96, 1)                                   # channel padding path (96 -> 128)
    run_case(32, 256, 2, force_two_pass=True,            # large-N two-pass path (forced small)
             two_pass_tiles=(128, 8))

    print("KERNEL_OK")
</pallas_src>

<mosaic_0001>
module attributes {stable_mosaic.version = 11 : i64} {
  func.func @_modulation_kernel(%arg0: i32, %arg1: memref<8x256xf32, #tpu.memory_space<vmem>>, %arg2: memref<1x256xf32, #tpu.memory_space<vmem>>, %arg3: memref<1x256xf32, #tpu.memory_space<vmem>>, %arg4: memref<1x256xf32, #tpu.memory_space<vmem>>, %arg5: memref<1x256xf32, #tpu.memory_space<vmem>>, %arg6: memref<8x256xf32, #tpu.memory_space<vmem>>, %arg7: memref<1x256xf32, #tpu.memory_space<vmem>>, %arg8: memref<1x256xf32, #tpu.memory_space<vmem>>) attributes {dimension_semantics = [#tpu.dimension_semantics<parallel>], iteration_bounds = array<i64: 1>, scalar_prefetch = 0 : i64, scratch_operands = 0 : i64, tpu.core_type = #tpu.core_type<tc>, window_params = [{transform_indices = @transform_0, window_bounds = array<i64: 8, 256>}, {transform_indices = @transform_1, window_bounds = array<i64: 1, 256>}, {transform_indices = @transform_2, window_bounds = array<i64: 1, 256>}, {transform_indices = @transform_3, window_bounds = array<i64: 1, 256>}, {transform_indices = @transform_4, window_bounds = array<i64: 1, 256>}, {transform_indices = @transform_5, window_bounds = array<i64: 8, 256>}, {transform_indices = @transform_6, window_bounds = array<i64: 1, 256>}, {transform_indices = @transform_7, window_bounds = array<i64: 1, 256>}]} {
    %c0 = arith.constant 0 : index
    %c0_0 = arith.constant 0 : index
    %0 = vector.load %arg1[%c0, %c0_0] : memref<8x256xf32, #tpu.memory_space<vmem>>, vector<8x256xf32>
    %cst = arith.constant dense<0.000000e+00> : vector<256xf32>
    %1 = vector.multi_reduction <add>, %0, %cst [0] : vector<8x256xf32> to vector<256xf32>
    %2 = vector.shape_cast %1 : vector<256xf32> to vector<1x256xf32>
    %cst_1 = arith.constant 1.250000e-01 : f32
    %3 = vector.broadcast %cst_1 : f32 to vector<1x256xf32>
    %4 = arith.mulf %2, %3 : vector<1x256xf32>
    %5 = vector.broadcast %4 : vector<1x256xf32> to vector<8x256xf32>
    %6 = arith.subf %0, %5 : vector<8x256xf32>
    %7 = arith.mulf %6, %6 : vector<8x256xf32>
    %cst_2 = arith.constant dense<0.000000e+00> : vector<256xf32>
    %8 = vector.multi_reduction <add>, %7, %cst_2 [0] : vector<8x256xf32> to vector<256xf32>
    %9 = vector.shape_cast %8 : vector<256xf32> to vector<1x256xf32>
    %cst_3 = arith.constant 1.250000e-01 : f32
    %10 = vector.broadcast %cst_3 : f32 to vector<1x256xf32>
    %11 = arith.mulf %9, %10 : vector<1x256xf32>
    %cst_4 = arith.constant 9.99999974E-6 : f32
    %12 = vector.broadcast %cst_4 : f32 to vector<1x256xf32>
    %13 = arith.addf %11, %12 : vector<1x256xf32>
    %14 = math.rsqrt %13 : vector<1x256xf32>
    %c0_5 = arith.constant 0 : index
    %c0_6 = arith.constant 0 : index
    %15 = vector.load %arg2[%c0_5, %c0_6] : memref<1x256xf32, #tpu.memory_space<vmem>>, vector<1x256xf32>
    %c0_7 = arith.constant 0 : index
    %c0_8 = arith.constant 0 : index
    %16 = vector.load %arg3[%c0_7, %c0_8] : memref<1x256xf32, #tpu.memory_space<vmem>>, vector<1x256xf32>
    %17 = arith.mulf %15, %14 : vector<1x256xf32>
    %18 = arith.mulf %4, %17 : vector<1x256xf32>
    %19 = arith.subf %16, %18 : vector<1x256xf32>
    %20 = vector.broadcast %17 : vector<1x256xf32> to vector<8x256xf32>
    %21 = arith.mulf %0, %20 : vector<8x256xf32>
    %22 = vector.broadcast %19 : vector<1x256xf32> to vector<8x256xf32>
    %23 = arith.addf %21, %22 : vector<8x256xf32>
    %c0_9 = arith.constant 0 : index
    %c0_10 = arith.constant 0 : index
    %24 = vector.load %arg6[%c0_9, %c0_10] : memref<8x256xf32, #tpu.memory_space<vmem>>, vector<8x256xf32>
    tpu.vector_store %arg6[%c0_9, %c0_10], %23 {strides = array<i32>} : memref<8x256xf32, #tpu.memory_space<vmem>>, vector<8x256xf32>,
    %cst_11 = arith.constant 1.000000e-01 : f32
    %25 = vector.broadcast %cst_11 : f32 to vector<1x256xf32>
    %26 = arith.mulf %25, %4 : vector<1x256xf32>
    %c0_12 = arith.constant 0 : index
    %c0_13 = arith.constant 0 : index
    %27 = vector.load %arg4[%c0_12, %c0_13] : memref<1x256xf32, #tpu.memory_space<vmem>>, vector<1x256xf32>
    %cst_14 = arith.constant 0.899999976 : f32
    %28 = vector.broadcast %cst_14 : f32 to vector<1x256xf32>
    %29 = arith.mulf %28, %27 : vector<1x256xf32>
    %30 = arith.addf %26, %29 : vector<1x256xf32>
    %c0_15 = arith.constant 0 : index
    %c0_16 = arith.constant 0 : index
    %31 = vector.load %arg7[%c0_15, %c0_16] : memref<1x256xf32, #tpu.memory_space<vmem>>, vector<1x256xf32>
    tpu.vector_store %arg7[%c0_15, %c0_16], %30 {strides = array<i32>} : memref<1x256xf32, #tpu.memory_space<vmem>>, vector<1x256xf32>,
    %cst_17 = arith.constant 1.000000e-01 : f32
    %32 = vector.broadcast %cst_17 : f32 to vector<1x256xf32>
    %33 = arith.mulf %32, %11 : vector<1x256xf32>
    %c0_18 = arith.constant 0 : index
    %c0_19 = arith.constant 0 : index
    %34 = vector.load %arg5[%c0_18, %c0_19] : memref<1x256xf32, #tpu.memory_space<vmem>>, vector<1x256xf32>
    %cst_20 = arith.constant 0.899999976 : f32
    %35 = vector.broadcast %cst_20 : f32 to vector<1x256xf32>
    %36 = arith.mulf %35, %34 : vector<1x256xf32>
    %37 = arith.addf %33, %36 : vector<1x256xf32>
    %c0_21 = arith.constant 0 : index
    %c0_22 = arith.constant 0 : index
    %38 = vector.load %arg8[%c0_21, %c0_22] : memref<1x256xf32, #tpu.memory_space<vmem>>, vector<1x256xf32>
    tpu.vector_store %arg8[%c0_21, %c0_22], %37 {strides = array<i32>} : memref<1x256xf32, #tpu.memory_space<vmem>>, vector<1x256xf32>,
    return
  }
  func.func @transform_0(%arg0: i32) -> (i32, i32) {
    %c0_i32 = arith.constant 0 : i32
    %c0_i32_0 = arith.constant 0 : i32
    return %c0_i32, %arg0 : i32, i32
  }
  func.func @transform_1(%arg0: i32) -> (i32, i32) {
    %c0_i32 = arith.constant 0 : i32
    %c0_i32_0 = arith.constant 0 : i32
    return %c0_i32, %arg0 : i32, i32
  }
  func.func @transform_2(%arg0: i32) -> (i32, i32) {
    %c0_i32 = arith.constant 0 : i32
    %c0_i32_0 = arith.constant 0 : i32
    return %c0_i32, %arg0 : i32, i32
  }
  func.func @transform_3(%arg0: i32) -> (i32, i32) {
    %c0_i32 = arith.constant 0 : i32
    %c0_i32_0 = arith.constant 0 : i32
    return %c0_i32, %arg0 : i32, i32
  }
  func.func @transform_4(%arg0: i32) -> (i32, i32) {
    %c0_i32 = arith.constant 0 : i32
    %c0_i32_0 = arith.constant 0 : i32
    return %c0_i32, %arg0 : i32, i32
  }
  func.func @transform_5(%arg0: i32) -> (i32, i32) {
    %c0_i32 = arith.constant 0 : i32
    %c0_i32_0 = arith.constant 0 : i32
    return %c0_i32, %arg0 : i32, i32
  }
  func.func @transform_6(%arg0: i32) -> (i32, i32) {
    %c0_i32 = arith.constant 0 : i32
    %c0_i32_0 = arith.constant 0 : i32
    return %c0_i32, %arg0 : i32, i32
  }
  func.func @transform_7(%arg0: i32) -> (i32, i32) {
    %c0_i32 = arith.constant 0 : i32
    %c0_i32_0 = arith.constant 0 : i32
    return %c0_i32, %arg0 : i32, i32
  }
}

</mosaic_0001>

<bundles_post_ra>
// kernel: tpu_custom_call.1
= control target key start
LH: loop header
LB: loop body
LE: loop exit
PB: predicated region body
PF: predicated region fallthrough
CT: control target
= control target key end

     0   :  { %13 = vsyncpa [#allocation3], 0  ;;  %s523_s0 = inlined_call_operand.hbm [shape: f32[8,256], index: 0, kind: input, shape index: {}]   ;;  %s524_s1 = inlined_call_operand.vmem [shape: f32[1,256], index: 1, kind: input, shape index: {}]   ;;  %s525_s2 = inlined_call_operand.vmem [shape: f32[1,256], index: 2, kind: input, shape index: {}]   ;;  %s526_s3 = inlined_call_operand.vmem [shape: f32[1,256], index: 3, kind: input, shape index: {}]   ;;  %s527_s4 = inlined_call_operand.vmem [shape: f32[1,256], index: 4, kind: input, shape index: {}]   ;;  %s528_s5 = inlined_call_operand.hbm [shape: f32[8,256], index: 5, kind: output, shape index: {0}]   ;;  %s529_s6 = inlined_call_operand.hbm [shape: f32[1,256], index: 6, kind: output, shape index: {1}]   ;;  %s530_s7 = inlined_call_operand.hbm [shape: f32[1,256], index: 7, kind: output, shape index: {2}]  }
   0x1   :  { %14 = vsyncpa [#allocation4], 0 }
   0x2   :  { %15 = vsyncpa [#allocation7], 0  ;;  %s366_s24 = smov [#allocation2]   ;;  %s272_s28 = scalar_lea.hbm %s523_s0, 256 }
   0x3   :  { %s22_s25 = sshll.u32 %s366_s24, 4  ;;  %p273_p0 = scmp.ne.s32.totalorder %s523_s0, %s272_s28  ;;  %s23_s25 = int_to_ptr.vmem [resolvable:$true] %s22_s25 }
   0x4   :  { %p276_p1 = scmp.lt.u32.totalorder %s272_s28, %s523_s0 }
   0x6   :  { %p278_p2 = pnand %p276_p1, %p273_p0 }
   0x8   :  { %281 = shalt.err (!%p278_p2)
}
   0x9   :  { %s282_s10 = scalar_lea.vmem %s23_s25, 256  ;;  %p287_p4 = scmp.lt.s32.totalorder %s23_s25, %s23_s25 }
   0xa   :  { %p283_p3 = scmp.ne.s32.totalorder %s23_s25, %s282_s10  ;;  %p288_p5 = scmp.lt.s32.totalorder %s282_s10, %s282_s10 }
   0xc   :  { %p289_p6 = por %p288_p5, %p287_p4 }
   0xe   :  { %p290_p7 = pnand %p289_p6, %p283_p3 }
  0x10   :  { %293 = shalt.err (!%p290_p7)
}
  0x11   :  { %25 = dma.hbm_to_vmem [thread:$0]  %s523_s0, 256, %s23_s25, [#allocation3]  }
  0x12   :  { %360 = dma.done.wait [#allocation3], 256  }
  0x13   :  { %361 = vsyncadd [#allocation3], 4294967040  ;;  %v423_v0 = vld [vmem:[#allocation2] sm:$0xff]  ;;  %v425_v1 = vld [vmem:[#allocation2 + $0x8] sm:$0xff]  ;;  %v83_v8 = vlaneseq  ;;  %v367_v16 = vmov 1966171168  }
  0x14   :  { %v39_v2 = vrot.slane %v423_v0, 4  ;;  %v45_v3 = vrot.slane %v425_v1, 4  ;;  %v147_v9 = vld [vmem:[%s526_s3] sm:$0x3]  ;;  %v81_v17 = vunpack.c.l.s4 %v367_v16  ;;  %s368_s0 = smov [#allocation6]  }
  0x15   :  { %v84_v14 = vshrl.u32 %v83_v8, 7  ;;  %v148_v15 = vmul.f32 0.9, %v147_v9  ;;  %s237_s3 = sshll.u32 %s368_s0, 4  ;;  %vm453_vm0 = vcmp.lt.s32.totalorder %v83_v8, 256  ;;  %s238_s3 = int_to_ptr.vmem [resolvable:$true] %s237_s3 }
  0x16   :  { %v40_v4 = vadd.f32 %v39_v2, %v423_v0  ;;  %v46_v5 = vadd.f32 %v45_v3, %v425_v1  ;;  %v82_v26 = vunpack.c.0.s8 %v81_v17  ;;  %v187_v46 = vld [vmem:[%s527_s4] sm:$0x3]  ;;  %s294_s17 = scalar_lea.vmem %s238_s3, 32  ;;  %p299_p9 = scmp.lt.s32.totalorder %s238_s3, %s238_s3 }
  0x17   :  { %v434_v20 = vsub.s32 0, %v84_v14  ;;  %v436_v21 = vsub.s32 1, %v84_v14  ;;  %p295_p8 = scmp.ne.s32.totalorder %s238_s3, %s294_s17  ;;  %p300_p10 = scmp.lt.s32.totalorder %s294_s17, %s294_s17 }
  0x18   :  { %v41_v6 = vrot.slane %v40_v4, 2  ;;  %v47_v7 = vrot.slane %v46_v5, 2  ;;  %v450_v37 = vsub.s32 %v82_v26, %v84_v14 }
  0x19   :  { %v153_v24 = vrot.slane %v148_v15, %v434_v20  ;;  %v157_v25 = vrot.slane %v148_v15, %v436_v21  ;;  %p301_p11 = por %p300_p10, %p299_p9 }
  0x1a   :  { %v42_v10 = vadd.f32 %v41_v6, %v40_v4  ;;  %v48_v11 = vadd.f32 %v47_v7, %v46_v5 }
  0x1b   :  { %p302_p12 = pnand %p301_p11, %p295_p8 }
  0x1c   :  { %v43_v12 = vrot.slane %v42_v10, 1  ;;  %v49_v13 = vrot.slane %v48_v11, 1 }
  0x1e   :  { %v44_v18 = vadd.f32 %v43_v12, %v42_v10  ;;  %v50_v19 = vadd.f32 %v49_v13, %v48_v11 }
  0x20   :  { %v438_v22 = vmul.f32 0.125, %v44_v18  ;;  %v440_v23 = vmul.f32 0.125, %v50_v19 }
  0x22   :  { %v53_v27 = vsub.f32 %v423_v0, %v438_v22  ;;  %v54_v28 = vsub.f32 %v425_v1, %v440_v23  ;;  %v145_v29 = vmul.f32 0.1, %v438_v22  ;;  %v146_v30 = vmul.f32 0.1, %v440_v23 }
  0x24   :  { %v55_v31 = vmul.f32 %v53_v27, %v53_v27  ;;  %v56_v32 = vmul.f32 %v54_v28, %v54_v28  ;;  %v160_v33 = vadd.f32 %v153_v24, %v145_v29  ;;  %v161_v34 = vadd.f32 %v157_v25, %v146_v30 }
  0x26   :  { %v57_v35 = vrot.slane %v55_v31, 4  ;;  %v63_v36 = vrot.slane %v56_v32, 4  ;;  %v164_v38 = vcombine.low %v160_v33, %v161_v34 }
  0x28   :  { %v58_v39 = vadd.f32 %v57_v35, %v55_v31  ;;  %v64_v40 = vadd.f32 %v63_v36, %v56_v32  ;;  %v171_v41 = vrot.slane %v164_v38, %v450_v37 }
  0x2a   :  { %v59_v43 = vrot.slane %v58_v39, 2  ;;  %v65_v44 = vrot.slane %v64_v40, 2  ;;  %v178_v45 = vrot.slane %v171_v41, %v450_v37 }
  0x2c   :  { %v60_v47 = vadd.f32 %v59_v43, %v58_v39  ;;  %v66_v48 = vadd.f32 %v65_v44, %v64_v40  ;;  %184 = vst.msk [vmem:[#allocation6] sm:$0x3] %vm453_vm0, %v178_v45 }
  0x2d   :  { %305 = shalt.err (!%p302_p12)
}
  0x2e   :  { %s306_s20 = scalar_lea.hbm %s529_s6, 32 }
  0x2f   :  { %p307_p13 = scmp.ne.s32.totalorder %s529_s6, %s306_s20  ;;  %p310_p0 = scmp.lt.u32.totalorder %s306_s20, %s529_s6 }
  0x31   :  { %p312_p1 = pnand %p310_p0, %p307_p13 }
  0x33   :  { %315 = shalt.err (!%p312_p1)
}
  0x34   :  { %240 = dma.vmem_to_hbm [thread:$0]  %s238_s3, 32, %s529_s6, [#allocation7]   ;;  %v61_v49 = vrot.slane %v60_v47, 1  ;;  %v67_v50 = vrot.slane %v66_v48, 1  ;;  %v188_v51 = vmul.f32 0.9, %v187_v46 }
  0x35   :  { %s369_s6 = smov [#allocation8]  }
  0x36   :  { %v62_v52 = vadd.f32 %v61_v49, %v60_v47  ;;  %v68_v53 = vadd.f32 %v67_v50, %v66_v48  ;;  %v193_v56 = vrot.slane %v188_v51, %v434_v20  ;;  %v197_v57 = vrot.slane %v188_v51, %v436_v21  ;;  %s247_s26 = sshll.u32 %s369_s6, 4  ;;  %s248_s26 = int_to_ptr.vmem [resolvable:$true] %s247_s26 }
  0x37   :  { %s316_s27 = scalar_lea.vmem %s248_s26, 32  ;;  %p321_p3 = scmp.lt.s32.totalorder %s248_s26, %s248_s26 }
  0x38   :  { %v69_v54 = vmul.f32 0.125, %v62_v52  ;;  %v70_v55 = vmul.f32 0.125, %v68_v53  ;;  %p317_p2 = scmp.ne.s32.totalorder %s248_s26, %s316_s27  ;;  %p322_p4 = scmp.lt.s32.totalorder %s316_s27, %s316_s27 }
  0x3a   :  { %v71_v58 = vadd.f32 1e-05, %v69_v54  ;;  %v72_v59 = vadd.f32 1e-05, %v70_v55  ;;  %v185_v60 = vmul.f32 0.1, %v69_v54  ;;  %p323_p5 = por %p322_p4, %p321_p3 }
  0x3b   :  { %v186_v61 = vmul.f32 0.1, %v70_v55 }
  0x3c   :  { %268 = vrsqrt.f32 %v71_v58  ;;  %v200_v62 = vadd.f32 %v193_v56, %v185_v60  ;;  %p324_p6 = pnand %p323_p5, %p317_p2 }
  0x3d   :  { %270 = vrsqrt.f32 %v72_v59  ;;  %v201_v63 = vadd.f32 %v197_v57, %v186_v61 }
  0x3f   :  { %v204_v2 = vcombine.low %v200_v62, %v201_v63 }
  0x41   :  { %v211_v3 = vrot.slane %v204_v2, %v450_v37 }
  0x43   :  { %v218_v4 = vrot.slane %v211_v3, %v450_v37 }
  0x45   :  { %220 = vst.msk [vmem:[#allocation8] sm:$0x3] %vm453_vm0, %v218_v4 }
  0x46   :  { %v269_v5 = vpop.eup %268 }
  0x47   :  { %327 = shalt.err (!%p324_p6)
}
  0x48   :  { %s328_s30 = scalar_lea.hbm %s530_s7, 32 }
  0x49   :  { %p329_p7 = scmp.ne.s32.totalorder %s530_s7, %s328_s30  ;;  %p332_p8 = scmp.lt.u32.totalorder %s328_s30, %s530_s7 }
  0x4b   :  { %p334_p9 = pnand %p332_p8, %p329_p7 }
  0x4d   :  { %337 = shalt.err (!%p334_p9)
}
  0x4e   :  { %250 = dma.vmem_to_hbm [thread:$0]  %s248_s26, 32, %s530_s7, [#allocation7]   ;;  %v271_v6 = vpop.eup %270  ;;  %v75_v9 = vld [vmem:[%s524_s1] sm:$0x3] }
  0x4f   :  { %v79_v7 = vcombine.low %v269_v5, %v271_v6  ;;  %v76_v18 = vld [vmem:[%s525_s2] sm:$0x3]  ;;  %s370_s1 = smov [#allocation5]  }
  0x50   :  { %s227_s15 = sshll.u32 %s370_s1, 4  ;;  %s228_s15 = int_to_ptr.vmem [resolvable:$true] %s227_s15 }
  0x51   :  { %v86_v8 = vrot.slane %v79_v7, %v450_v37  ;;  %s338_s16 = scalar_lea.vmem %s228_s15, 256  ;;  %p343_p11 = scmp.lt.s32.totalorder %s228_s15, %s228_s15 }
  0x52   :  { %p339_p10 = scmp.ne.s32.totalorder %s228_s15, %s338_s16  ;;  %p344_p12 = scmp.lt.s32.totalorder %s338_s16, %s338_s16 }
  0x53   :  { %v93_v10 = vrot.slane %v86_v8, %v450_v37 }
  0x54   :  { %p345_p13 = por %p344_p12, %p343_p11 }
  0x55   :  { %v95_v11 = vmul.f32 %v93_v10, %v75_v9 }
  0x56   :  { %p346_p0 = pnand %p345_p13, %p339_p10 }
  0x57   :  { %v100_v12 = vrot.slane %v95_v11, %v434_v20  ;;  %v104_v13 = vrot.slane %v95_v11, %v436_v21 }
  0x59   :  { %v107_v14 = vmul.f32 %v100_v12, %v438_v22  ;;  %v108_v15 = vmul.f32 %v104_v13, %v440_v23  ;;  %v128_v25 = vmul.f32 %v100_v12, %v423_v0  ;;  %v129_v26 = vmul.f32 %v104_v13, %v425_v1 }
  0x5b   :  { %v111_v16 = vcombine.low %v107_v14, %v108_v15 }
  0x5d   :  { %v118_v17 = vrot.slane %v111_v16, %v450_v37 }
  0x5f   :  { %v125_v19 = vrot.slane %v118_v17, %v450_v37 }
  0x61   :  { %v127_v24 = vsub.f32 %v76_v18, %v125_v19 }
  0x63   :  { %v134_v22 = vrot.slane %v127_v24, %v434_v20  ;;  %v138_v23 = vrot.slane %v127_v24, %v436_v21 }
  0x65   :  { %v141_v27 = vadd.f32 %v134_v22, %v128_v25  ;;  %v142_v28 = vadd.f32 %v138_v23, %v129_v26 }
  0x67   :  { %143 = vst [vmem:[#allocation5] sm:$0xff] %v141_v27  ;;  %144 = vst [vmem:[#allocation5 + $0x8] sm:$0xff] %v142_v28 }
  0x68   :  { %349 = shalt.err (!%p346_p0)
}
  0x69   :  { %s350_s18 = scalar_lea.hbm %s528_s5, 256 }
  0x6a   :  { %p351_p1 = scmp.ne.s32.totalorder %s528_s5, %s350_s18  ;;  %p354_p2 = scmp.lt.u32.totalorder %s350_s18, %s528_s5 }
  0x6c   :  { %p356_p3 = pnand %p354_p2, %p351_p1 }
  0x6e   :  { %359 = shalt.err (!%p356_p3)
}
  0x6f   :  { %230 = dma.vmem_to_hbm [thread:$0]  %s228_s15, 256, %s528_s5, [#allocation4]  }
  0x70   :  { %362 = dma.done.wait [#allocation4], 256  }
  0x71   :  { %363 = vsyncadd [#allocation4], 4294967040 }
  0x72   :  { %364 = dma.done.wait [#allocation7], 64  }
  0x73   :  { %365 = vsyncadd [#allocation7], 4294967232 }
  0x74   :  { %260 = vsyncpa [#allocation3], 1 }
  0x75   :  { %261 = vsyncpa [#allocation4], 1 }
  0x76   :  { %262 = vsyncpa [#allocation7], 1 }

</bundles_post_ra>
